<compile_context>
chip_gen: v7x
topology: tpu7x:2x2x1
jax: 0.10.0
libtpu: 0.0.40
codegen_flags: <defaults>
</compile_context>

<pallas_src>
import functools

import jax
import jax.numpy as jnp
from jax.experimental import pallas as pl
from jax.experimental.pallas import tpu as pltpu


def _make_dw_kernel(ksize: int, t_blk: int, has_halo: bool):
    """Depthwise-conv body for one (batch, time-block) grid point.

    Block layout (channels on sublanes, time on lanes):
      x_ref  : (1, C, t_blk)   current input time block
      xh_ref : (1, C, 128)     first 128 lanes of the NEXT block (only if ksize > 1)
      w_ref  : (C, ksize)      per-channel taps (resident)
      b_ref  : (C, 1)          per-channel bias (resident)
      o_ref  : (1, C, t_blk)   output time block
    """

    def kernel(*refs):
        if has_halo:
            x_ref, xh_ref, w_ref, b_ref, o_ref = refs
            x = jnp.concatenate([x_ref[0], xh_ref[0]], axis=-1)   # (C, t_blk + 128)
        else:
            x_ref, w_ref, b_ref, o_ref = refs
            x = x_ref[0]                                          # (C, t_blk)

        x = x.astype(jnp.float32)
        w = w_ref[...].astype(jnp.float32)        # (C, K)
        b = b_ref[...].astype(jnp.float32)        # (C, 1)
        c = o_ref.shape[1]

        acc = jnp.zeros((c, t_blk), jnp.float32)
        for k in range(ksize):                    # K is small & static -> unrolled
            acc = acc + w[:, k:k + 1] * x[:, k:k + t_blk]
        o_ref[0] = (acc + b).astype(o_ref.dtype)

    return kernel


def _pick_time_block(channels: int, itemsize: int, t_dense: int, halo: int) -> int:
    """Largest useful time block in {512, 256, 128} fitting a ~12 MiB VMEM budget
    (double-buffered x block + halo block + out block) -- safe on v5e/v6e/v7x."""
    budget = 12 * 1024 * 1024

    def est(tb):
        return 2 * channels * (2 * tb + halo) * itemsize

    t_blk = 512
    while t_blk > 128 and (t_blk // 2 >= t_dense or est(t_blk) > budget):
        t_blk //= 2
    return t_blk


@functools.partial(jax.jit, static_argnames=("stride", "padding", "time_block"))
def depthwise_conv1d(x, weight, bias=None, *, stride: int = 1, padding: int = 0,
                     time_block=None):
    """Depthwise 1-D convolution matching nn.Conv1d(groups=in_channels).

    Args:
      x:      (batch, in_channels, time)
      weight: (out_channels, 1, kernel_size)   -- PyTorch grouped-conv weight
      bias:   (out_channels,) or None
    Returns:
      (batch, out_channels, time_out), time_out = (time + 2*padding - K)//stride + 1
    """
    batch, in_ch, time = x.shape
    out_ch, _, ksize = weight.shape
    assert out_ch % in_ch == 0, "out_channels must be a multiple of in_channels"
    mult = out_ch // in_ch
    assert ksize - 1 <= 128, "kernel_size - 1 must fit in one 128-lane halo block"

    t_cp = time + 2 * padding                    # conv-padded length
    assert t_cp >= ksize, "input too short for this kernel_size/padding"
    t_dense = t_cp - ksize + 1                   # stride-1 output length
    # TODO(synk): stride > 1 is realized as dense stride-1 compute + output subsample
    # (typical Conformer depthwise usage is stride=1); a DMA-level strided read would
    # avoid the extra compute.

    has_halo = ksize > 1
    halo = 128 if has_halo else 0
    itemsize = jnp.dtype(x.dtype).itemsize
    if time_block is None:
        t_blk = _pick_time_block(out_ch, itemsize, t_dense, halo)
    else:
        assert time_block > 0 and time_block % 128 == 0
        t_blk = int(time_block)
    n_blk = pl.cdiv(t_dense, t_blk)
    t_alloc = n_blk * t_blk                      # padded dense-output length
    t_x_alloc = t_alloc + halo                   # padded input length (halo in-bounds)

    # --- glue (no transposes; layout stays (B, C, T)) ---
    if mult > 1:                                 # groups: out channel o reads x[o//mult]
        x = jnp.repeat(x, mult, axis=1)
    # conv zero-padding and tile-alignment padding fused into a single pad
    x = jnp.pad(x, ((0, 0), (0, 0), (padding, t_x_alloc - time - padding)))

    w2 = weight[:, 0, :]                         # (Cout, K)
    if bias is None:
        b2 = jnp.zeros((out_ch, 1), x.dtype)
    else:
        b2 = bias.reshape(out_ch, 1).astype(x.dtype)

    kernel = _make_dw_kernel(ksize, t_blk, has_halo)

    in_specs = [pl.BlockSpec((1, out_ch, t_blk), lambda b, i: (b, 0, i))]
    inputs = [x]
    if has_halo:
        halo_blocks = t_blk // 128
        in_specs.append(
            pl.BlockSpec((1, out_ch, 128), lambda b, i: (b, 0, (i + 1) * halo_blocks)))
        inputs.append(x)                         # same array, halo window of next block
    in_specs += [
        pl.BlockSpec((out_ch, ksize), lambda b, i: (0, 0)),   # weight: resident
        pl.BlockSpec((out_ch, 1), lambda b, i: (0, 0)),       # bias:   resident
    ]
    inputs += [w2, b2]

    out_dense = pl.pallas_call(
        kernel,
        out_shape=jax.ShapeDtypeStruct((batch, out_ch, t_alloc), x.dtype),
        grid_spec=pltpu.PrefetchScalarGridSpec(
            num_scalar_prefetch=0,
            grid=(batch, n_blk),
            in_specs=in_specs,
            out_specs=pl.BlockSpec((1, out_ch, t_blk), lambda b, i: (b, 0, i)),
        ),
        compiler_params=pltpu.CompilerParams(
            dimension_semantics=("parallel", "parallel"),   # v7x: shard over both TCs
            vmem_limit_bytes=32 * 1024 * 1024,
        ),
        cost_estimate=pl.CostEstimate(
            flops=2 * batch * out_ch * t_alloc * ksize,
            transcendentals=0,
            bytes_accessed=itemsize * batch * out_ch * (t_x_alloc + halo * n_blk + t_alloc)
            + w2.size * itemsize + b2.size * itemsize,
        ),
    )(*inputs)

    # drop alignment padding and apply stride (identity when stride=1 and aligned)
    return out_dense[:, :, :t_dense:stride]


def _reference_conv1d(x, weight, bias, stride, padding, groups):
    out = jax.lax.conv_general_dilated(
        x, weight, window_strides=(stride,), padding=[(padding, padding)],
        dimension_numbers=("NCH", "OIH", "NCH"), feature_group_count=groups)
    if bias is not None:
        out = out + bias[None, :, None]
    return out


if __name__ == "__main__":
    key = jax.random.PRNGKey(0)
    k1, k2, k3, k4, k5 = jax.random.split(key, 5)

    # Config A: Conformer-style depthwise conv, mult=2, K=3, stride=1, bias=False.
    # time_block=128 forces 2 time blocks so the halo crosses a real block boundary.
    B, Cin, mult, K, T = 2, 16, 2, 3, 200
    Cout = mult * Cin
    x = jax.random.normal(k1, (B, Cin, T), dtype=jnp.float32)
    bound = (1.0 / K) ** 0.5    # PyTorch Conv1d init: U(-sqrt(k), sqrt(k)), k=1/((Cin/g)*K)
    w_a = jax.random.uniform(k2, (Cout, 1, K), minval=-bound, maxval=bound,
                             dtype=jnp.float32)
    out_a = depthwise_conv1d(x, w_a, None, stride=1, padding=1, time_block=128)
    jax.block_until_ready(out_a)
    ref_a = _reference_conv1d(x, w_a, None, 1, 1, Cin)
    assert out_a.shape == (B, Cout, T)
    assert jnp.allclose(out_a, ref_a, atol=1e-5, rtol=1e-5)

    # Config B: strided + biased variant, mult=1, K=5, stride=2, padding=2.
    B2, C2, K2, T2, s2, p2 = 2, 8, 5, 48, 2, 2
    x_b = jax.random.normal(k3, (B2, C2, T2), dtype=jnp.float32)
    bound2 = (1.0 / K2) ** 0.5
    w_b = jax.random.uniform(k4, (C2, 1, K2), minval=-bound2, maxval=bound2,
                             dtype=jnp.float32)
    bias_b = jax.random.uniform(k5, (C2,), minval=-bound2, maxval=bound2,
                                dtype=jnp.float32)
    out_b = depthwise_conv1d(x_b, w_b, bias_b, stride=s2, padding=p2)
    jax.block_until_ready(out_b)
    ref_b = _reference_conv1d(x_b, w_b, bias_b, s2, p2, C2)
    t_out_b = (T2 + 2 * p2 - K2) // s2 + 1
    assert out_b.shape == (B2, C2, t_out_b)
    assert jnp.allclose(out_b, ref_b, atol=1e-5, rtol=1e-5)

    print("KERNEL_OK")
</pallas_src>

<mosaic_0001>
module attributes {stable_mosaic.version = 11 : i64} {
  func.func @kernel(%arg0: i32, %arg1: i32, %arg2: memref<1x32x128xf32, #tpu.memory_space<vmem>>, %arg3: memref<1x32x128xf32, #tpu.memory_space<vmem>>, %arg4: memref<32x3xf32, #tpu.memory_space<vmem>>, %arg5: memref<32x1xf32, #tpu.memory_space<vmem>>, %arg6: memref<1x32x128xf32, #tpu.memory_space<vmem>>) attributes {dimension_semantics = [#tpu.dimension_semantics<parallel>, #tpu.dimension_semantics<parallel>], iteration_bounds = array<i64: 2, 2>, scalar_prefetch = 0 : i64, scratch_operands = 0 : i64, tpu.core_type = #tpu.core_type<tc>, window_params = [{transform_indices = @transform_0, window_bounds = array<i64: 1, 32, 128>}, {transform_indices = @transform_1, window_bounds = array<i64: 1, 32, 128>}, {pipeline_mode = #tpu.pipeline_mode<synchronous>, transform_indices = @transform_2, window_bounds = array<i64: 32, 3>}, {pipeline_mode = #tpu.pipeline_mode<synchronous>, transform_indices = @transform_3, window_bounds = array<i64: 32, 1>}, {transform_indices = @transform_4, window_bounds = array<i64: 1, 32, 128>}]} {
    %c0 = arith.constant 0 : index
    %c0_0 = arith.constant 0 : index
    %c0_1 = arith.constant 0 : index
    %0 = vector.load %arg2[%c0, %c0_0, %c0_1] : memref<1x32x128xf32, #tpu.memory_space<vmem>>, vector<1x32x128xf32>
    %1 = vector.shape_cast %0 : vector<1x32x128xf32> to vector<32x128xf32>
    %c0_2 = arith.constant 0 : index
    %c0_3 = arith.constant 0 : index
    %c0_4 = arith.constant 0 : index
    %2 = vector.load %arg3[%c0_2, %c0_3, %c0_4] : memref<1x32x128xf32, #tpu.memory_space<vmem>>, vector<1x32x128xf32>
    %3 = vector.shape_cast %2 : vector<1x32x128xf32> to vector<32x128xf32>
    %4 = tpu.concatenate %1, %3 in 1 : vector<32x128xf32>, vector<32x128xf32> -> vector<32x256xf32>
    %c0_5 = arith.constant 0 : index
    %c0_6 = arith.constant 0 : index
    %5 = vector.load %arg4[%c0_5, %c0_6] : memref<32x3xf32, #tpu.memory_space<vmem>>, vector<32x3xf32>
    %c0_7 = arith.constant 0 : index
    %c0_8 = arith.constant 0 : index
    %6 = vector.load %arg5[%c0_7, %c0_8] : memref<32x1xf32, #tpu.memory_space<vmem>>, vector<32x1xf32>
    %cst = arith.constant 0.000000e+00 : f32
    %7 = vector.broadcast %cst : f32 to vector<32x128xf32>
    %8 = vector.extract_strided_slice %5 {offsets = [0, 0], sizes = [32, 1], strides = [1, 1]} : vector<32x3xf32> to vector<32x1xf32>
    %9 = vector.extract_strided_slice %4 {offsets = [0, 0], sizes = [32, 128], strides = [1, 1]} : vector<32x256xf32> to vector<32x128xf32>
    %10 = vector.broadcast %8 : vector<32x1xf32> to vector<32x128xf32>
    %11 = arith.mulf %10, %9 : vector<32x128xf32>
    %12 = arith.addf %7, %11 : vector<32x128xf32>
    %13 = vector.extract_strided_slice %5 {offsets = [0, 1], sizes = [32, 1], strides = [1, 1]} : vector<32x3xf32> to vector<32x1xf32>
    %14 = vector.extract_strided_slice %4 {offsets = [0, 1], sizes = [32, 128], strides = [1, 1]} : vector<32x256xf32> to vector<32x128xf32>
    %15 = vector.broadcast %13 : vector<32x1xf32> to vector<32x128xf32>
    %16 = arith.mulf %15, %14 : vector<32x128xf32>
    %17 = arith.addf %12, %16 : vector<32x128xf32>
    %18 = vector.extract_strided_slice %5 {offsets = [0, 2], sizes = [32, 1], strides = [1, 1]} : vector<32x3xf32> to vector<32x1xf32>
    %19 = vector.extract_strided_slice %4 {offsets = [0, 2], sizes = [32, 128], strides = [1, 1]} : vector<32x256xf32> to vector<32x128xf32>
    %20 = vector.broadcast %18 : vector<32x1xf32> to vector<32x128xf32>
    %21 = arith.mulf %20, %19 : vector<32x128xf32>
    %22 = arith.addf %17, %21 : vector<32x128xf32>
    %23 = vector.broadcast %6 : vector<32x1xf32> to vector<32x128xf32>
    %24 = arith.addf %22, %23 : vector<32x128xf32>
    %c0_9 = arith.constant 0 : index
    %c0_10 = arith.constant 0 : index
    %c0_11 = arith.constant 0 : index
    %25 = vector.load %arg6[%c0_9, %c0_10, %c0_11] : memref<1x32x128xf32, #tpu.memory_space<vmem>>, vector<1x32x128xf32>
    %26 = vector.shape_cast %25 : vector<1x32x128xf32> to vector<32x128xf32>
    %27 = vector.shape_cast %24 : vector<32x128xf32> to vector<1x32x128xf32>
    tpu.vector_store %arg6[%c0_9, %c0_10, %c0_11], %27 {strides = array<i32>} : memref<1x32x128xf32, #tpu.memory_space<vmem>>, vector<1x32x128xf32>,
    return
  }
  func.func @transform_0(%arg0: i32, %arg1: i32) -> (i32, i32, i32) {
    %c0_i32 = arith.constant 0 : i32
    %c0_i32_0 = arith.constant 0 : i32
    return %arg0, %c0_i32, %arg1 : i32, i32, i32
  }
  func.func @transform_1(%arg0: i32, %arg1: i32) -> (i32, i32, i32) {
    %c1_i32 = arith.constant 1 : i32
    %0 = arith.addi %arg1, %c1_i32 : i32
    %c1_i32_0 = arith.constant 1 : i32
    %1 = arith.muli %0, %c1_i32_0 : i32
    %c0_i32 = arith.constant 0 : i32
    %c0_i32_1 = arith.constant 0 : i32
    return %arg0, %c0_i32, %1 : i32, i32, i32
  }
  func.func @transform_2(%arg0: i32, %arg1: i32) -> (i32, i32) {
    %c0_i32 = arith.constant 0 : i32
    %c0_i32_0 = arith.constant 0 : i32
    %c0_i32_1 = arith.constant 0 : i32
    return %c0_i32, %c0_i32_0 : i32, i32
  }
  func.func @transform_3(%arg0: i32, %arg1: i32) -> (i32, i32) {
    %c0_i32 = arith.constant 0 : i32
    %c0_i32_0 = arith.constant 0 : i32
    %c0_i32_1 = arith.constant 0 : i32
    return %c0_i32, %c0_i32_0 : i32, i32
  }
  func.func @transform_4(%arg0: i32, %arg1: i32) -> (i32, i32, i32) {
    %c0_i32 = arith.constant 0 : i32
    %c0_i32_0 = arith.constant 0 : i32
    return %arg0, %c0_i32, %arg1 : i32, i32, i32
  }
}

</mosaic_0001>

<bundles_post_ra>
// kernel: depthwise_conv1d.1
= control target key start
LH: loop header
LB: loop body
LE: loop exit
PB: predicated region body
PF: predicated region fallthrough
CT: control target
= control target key end

     0   :  { %9 = vsyncpa [#allocation5], 0  ;;  %s1169_s0 = inlined_call_operand.vmem [shape: f32[2,32,384], index: 0, kind: input, shape index: {}, may-alias: {0,1}]   ;;  %s1170_s1 = inlined_call_operand.vmem [shape: f32[2,32,384], index: 1, kind: input, shape index: {}, may-alias: {0,1}]   ;;  %s1171_s2 = inlined_call_operand.vmem [shape: f32[32,3], index: 2, kind: input, shape index: {}]   ;;  %s1172_s3 = inlined_call_operand.vmem [shape: f32[32,1], index: 3, kind: input, shape index: {}]   ;;  %s1173_s4 = inlined_call_operand.hbm [shape: f32[2,32,256], index: 4, kind: output, shape index: {}]  }
   0x1   :  { %11 = vsyncpa [#allocation5 + $0x1], 0  ;;  %s916_s15 = smov 0   ;;  %s918_s16 = smov 0  }
   0x2   :  { %s920_s17 = smov 0   ;;  %s922_s18 = smov 0  }
   0x3   :  { %s924_s19 = smov 0   ;;  %s926_s20 = smov 0  }
   0x4   :  { %s928_s21 = smov 0   ;;  %s930_s22 = smov 0  }
   0x5   :  { %s932_s23 = smov 0   ;;  %s934_s24 = smov 0  }
   0x6 LB: > { %s647_s25 = sadd.s32 4294967295, %s880_s24   ;;  %s648_s26 = sadd.s32 4294967294, %s880_s24   ;;  %s880_s24 = sphi %s934_s24, %s17_s24   ;;  %s876_s23 = sphi %s932_s23, %s1189_s23   ;;  %s872_s22 = sphi %s930_s22, %s1188_s22   ;;  %s868_s21 = sphi %s928_s21, %s1187_s21   ;;  %s864_s20 = sphi %s926_s20, %s1186_s20   ;;  %s860_s19 = sphi %s924_s19, %s1185_s19   ;;  %s856_s18 = sphi %s922_s18, %s1184_s18   ;;  %s852_s17 = sphi %s920_s17, %s1183_s17   ;;  %s848_s16 = sphi %s918_s16, %s1182_s16   ;;  %s844_s15 = sphi %s916_s15, %s1181_s15  }
   0x7   : > { %s26_s27 = sadd.s32 1, %s872_s22  ;;  %s29_s28 = sadd.s32 1, %s876_s23 }
   0x8   : > { %p27_p0 = scmp.ge.s32.totalorder %s26_s27, 2  ;;  %s38_s29 = sadd.s32 1, %s860_s19 }
   0x9   : > { %p45_p1 = scmp.ne.s32.totalorder %s860_s19, %s856_s18  ;;  %p46_p2 = scmp.eq.s32.totalorder %s880_s24, 0 }
   0xa   : > { %s974_s30 = scalar_select %p27_p0, 0, %s26_s27  }
   0xb   : > { %s1191_s28 = smov (!%p27_p0, %s29_s28), %s876_s23  ;;  %p984_p3 = por %p46_p2, %p45_p1 }
   0xc   : > { %s34_s5 = ssub.s32 %s872_s22, %s974_s30  ;;  %p31_p4 = scmp.ge.s32.totalorder %s1191_s28, 2 }
   0xd   : > { %s62_s7 = sadd.s32 1, %s974_s30  ;;  %s68_s9 = sadd.s32 1, %s852_s17 }
   0xe   : > { %s64_s8 = ssub.s32 %s26_s27, %s62_s7  ;;  %s1193_s28 = smov (%p31_p4, %s1191_s28), 0 }
   0xf   : > { %1176 = sst [smem:[#allocation7_spill]] %s1193_s28  ;;  %p75_p5 = scmp.ne.s32.totalorder %s852_s17, %s848_s16 }
  0x10   : > { %p149_p6 = scmp.eq.s32.totalorder %s647_s25, 3  ;;  %s33_s10 = ssub.s32 %s876_s23, %s1193_s28 }
  0x11   : > { %p154_p7 = scmp.ne.s32.totalorder %s856_s18, %s844_s15  ;;  %s35_s11 = sor.u32 %s34_s5, %s33_s10 }
  0x12   : > { %s65_s12 = sor.u32 %s64_s8, %s33_s10  ;;  %p36_p8 = scmp.eq.s32.totalorder %s35_s11, 0 }
  0x13   : > { %p66_p9 = scmp.eq.s32.totalorder %s65_s12, 0  ;;  %p1000_p10 = por %p75_p5, %p46_p2 }
  0x14   : > { %p1007_p11 = por %p149_p6, %p45_p1  ;;  %p155_p12 = scmp.eq.s32.totalorder %s648_s26, 3 }
  0x15   : > { %s1012_s27 = scalar_select %p36_p8, %s860_s19, %s38_s29  }
  0x16   : > { %s1015_s7 = scalar_select %p66_p9, %s852_s17, %s68_s9  }
  0x17   : > { %p1017_p13 = por %p155_p12, %p154_p7  ;;  %p650_p0 = scmp.ge.s32.totalorder %s880_s24, 4 }
  0x19   : > { %177 = sbr.rel (%p650_p0) target bundleno = 50 (0x32), region = 24 }
  0x20   : > { %180 = sbr.rel (!%p984_p3) target bundleno = 41 (0x29), region = 28  ;;  %s182_s5 = sand.u32 (%p984_p3), 1, %s860_s19  }
  0x21   : > { %s668_s8 = smul.u32 (%p984_p3), 12, %s876_s23  ;;  %s651_s29 = sshll.u32 (%p984_p3), %s182_s5, 5 }
  0x22   : > { %s184_s28 = scalar_lea.vmem (%p984_p3), [#allocation2], %s651_s29 }
  0x23   : > { %s186_s10 = sadd.s32 (%p984_p3), %s872_s22, %s668_s8 }
  0x24   : > { %s652_s9 = sshll.u32 (%p984_p3), %s186_s10, 3 }
  0x25   : > { %s188_s12 = scalar_lea.vmem (%p984_p3), %s1169_s0, %s652_s9 }
  0x26   : > { %v222_v0 = vld [vmem:[%s188_s12] sm:$0xff] (%p984_p3)  ;;  %v224_v1 = vld [vmem:[%s188_s12 + $0x18] sm:$0xff] (%p984_p3)  ;;  %v226_v2 = vld [vmem:[%s188_s12 + $0x30] sm:$0xff] (%p984_p3) }
  0x27   : > { %223 = vst [vmem:[%s184_s28] sm:$0xff] %v222_v0  ;;  %225 = vst [vmem:[%s184_s28 + $0x8] sm:$0xff] %v224_v1  ;;  %v228_v3 = vld [vmem:[%s188_s12 + $0x48] sm:$0xff] }
  0x28   : > { %227 = vst [vmem:[%s184_s28 + $0x10] sm:$0xff] %v226_v2  ;;  %229 = vst [vmem:[%s184_s28 + $0x18] sm:$0xff] %v228_v3 }
  0x29 PF: > { %235 = sbr.rel (!%p1000_p10) target bundleno = 50 (0x32), region = 66  ;;  %s237_s6 = sand.u32 (%p1000_p10), 1, %s852_s17  }
  0x2a   : > { %s575_s5 = smul.u32 (%p1000_p10), 12, %s876_s23  ;;  %s653_s8 = sshll.u32 (%p1000_p10), %s237_s6, 5 }
  0x2b   : > { %s239_s28 = scalar_lea.vmem (%p1000_p10), [#allocation3], %s653_s8 }
  0x2c   : > { %s576_s10 = sadd.s32 (%p1000_p10), %s872_s22, %s575_s5 }
  0x2d   : > { %s654_s9 = sshll.u32 (%p1000_p10), %s576_s10, 3 }
  0x2e   : > { %s578_s29 = scalar_lea.vmem (%p1000_p10), %s1170_s1, %s654_s9 }
  0x2f   : > { %v655_v4 = vld [vmem:[%s578_s29 + $0x8] sm:$0xff] (%p1000_p10)  ;;  %v656_v5 = vld [vmem:[%s578_s29 + $0x20] sm:$0xff] (%p1000_p10)  ;;  %v657_v6 = vld [vmem:[%s578_s29 + $0x38] sm:$0xff] (%p1000_p10) }
  0x30   : > { %279 = vst [vmem:[%s239_s28] sm:$0xff] %v655_v4  ;;  %281 = vst [vmem:[%s239_s28 + $0x8] sm:$0xff] %v656_v5  ;;  %v658_v7 = vld [vmem:[%s578_s29 + $0x50] sm:$0xff] }
  0x31   : > { %283 = vst [vmem:[%s239_s28 + $0x10] sm:$0xff] %v657_v6  ;;  %285 = vst [vmem:[%s239_s28 + $0x18] sm:$0xff] %v658_v7 }
  0x32 PF: > { %p659_p1 = scmp.ge.s32.totalorder %s880_s24, 1  ;;  %p290_p2 = scmp.lt.s32.totalorder %s880_s24, 5 }
  0x34   : > { %p291_p3 = pnand %p659_p1, %p290_p2 }
  0x35   : > { %v342_v8 = vld [vmem:[%s1171_s2] sm:$0xff] (!%p291_p3)  ;;  %v344_v9 = vld [vmem:[%s1171_s2 + $0x10] sm:$0xff] (!%p291_p3)  ;;  %v882_v10 = vmov (!%p291_p3), 1   ;;  %v343_v11 = vld [vmem:[%s1171_s2 + $0x8] sm:$0xff] (!%p291_p3)  ;;  %v883_v13 = vmov (!%p291_p3), 2   ;;  %v884_v14 = vmov (!%p291_p3), 0  }
  0x36   : > { %294 = sbr.rel (%p291_p3) target bundleno = 349 (0x15d), region = 104  ;;  %764 = vset.pattern.permute.xlu0 (!%p291_p3), %v882_v10  ;;  %765 = vset.pattern.permute.xlu1 (!%p291_p3), %v882_v10  ;;  %v345_v12 = vld [vmem:[%s1171_s2 + $0x18] sm:$0xff] (!%p291_p3)  ;;  %v346_v15 = vld [vmem:[%s1172_s3] sm:$0xff] (!%p291_p3)  ;;  %v348_v16 = vld [vmem:[%s1172_s3 + $0x10] sm:$0xff] (!%p291_p3)  ;;  %s297_s10 = sand.u32 (!%p291_p3), 1, %s856_s18   ;;  %vm426_vm0 = vcmask (!%p291_p3), 1039360  }
  0x37   : > { %379 = vperm.xlu0 (!%p291_p3), %764, %v342_v8   ;;  %387 = vperm.xlu1 (!%p291_p3), %765, %v344_v9   ;;  %v347_v17 = vld [vmem:[%s1172_s3 + $0x8] sm:$0xff] (!%p291_p3)  ;;  %v349_v18 = vld [vmem:[%s1172_s3 + $0x18] sm:$0xff] (!%p291_p3)  ;;  %s304_s9 = sand.u32 (!%p291_p3), 1, %s848_s16   ;;  %s1068_s11 = sshll.u32 (!%p291_p3), %s297_s10, 5  ;;  %vm487_vm1 = vcmask (!%p291_p3), 1031168  }
  0x38   : > { %s661_s26 = sshll.u32 (!%p291_p3), %s304_s9, 5  ;;  %s299_s29 = scalar_lea.vmem (!%p291_p3), [#allocation2], %s1068_s11 }
  0x39   : > { %v1071_v19 = vld [vmem:[%s299_s29] sm:$0xff] (!%p291_p3)  ;;  %s306_s28 = scalar_lea.vmem (!%p291_p3), [#allocation3], %s661_s26  ;;  %v1074_v24 = vld [vmem:[%s299_s29 + $0x8] sm:$0xff] (!%p291_p3)  ;;  %s885_s13 = smov (!%p291_p3), 127   ;;  %v1076_v27 = vld [vmem:[%s299_s29 + $0x10] sm:$0xff] (!%p291_p3) }
  0x3a   : > { %v338_v20 = vld [vmem:[%s306_s28] sm:$0xff] (!%p291_p3)  ;;  %v339_v25 = vld [vmem:[%s306_s28 + $0x8] sm:$0xff] (!%p291_p3)  ;;  %v340_v28 = vld [vmem:[%s306_s28 + $0x10] sm:$0xff] (!%p291_p3)  ;;  %s886_s16 = smov (!%p291_p3), 126   ;;  %s332_s12 = scalar_lea.vmem (!%p291_p3), [#allocation4], %s1068_s11 }
  0x3b   : > { %383 = vperm.xlu0 (!%p291_p3), %764, %v343_v11   ;;  %391 = vperm.xlu1 (!%p291_p3), %765, %v345_v12   ;;  %v1080_v35 = vld [vmem:[%s299_s29 + $0x18] sm:$0xff] (!%p291_p3)  ;;  %s664_s6 = sshll.u32 (!%p291_p3), %s868_s21, 3  ;;  %s543_s8 = sshll.u32 (!%p291_p3), %s332_s12, 4  ;;  %s1102_s8 = int_to_ptr.vmem [resolvable:$true] %s543_s8 }
  0x3c   : > { %v341_v36 = vld [vmem:[%s306_s28 + $0x18] sm:$0xff] (!%p291_p3)  ;;  %s540_s5 = sadd.s32 (!%p291_p3), %s864_s20, %s664_s6  ;;  %s1111_s26 = scalar_lea.sflag (!%p291_p3), [#allocation5], %s297_s10 }
  0x3d   : > { %s665_s21 = sshll.u32 %s540_s5, 7  ;;  %s770_s29 = scalar_lea.vmem %s1102_s8, 512 }
  0x3e   : > { %s1107_s11 = scalar_lea.hbm %s1173_s4, %s665_s21  ;;  %p771_p4 = scmp.ne.s32.totalorder %s1102_s8, %s770_s29 }
  0x3f   : > { %766 = vset.pattern.permute.xlu0 %v883_v13  ;;  %767 = vset.pattern.permute.xlu1 %v883_v13  ;;  %s887_s28 = smov [#allocation4]  }
  0x40   : > { %440 = vperm.xlu0 %766, %v342_v8   ;;  %444 = vperm.xlu1 %767, %v343_v11   ;;  %p772_p5 = pnand %p771_p4, %p1007_p11 }
  0x42   : > { %p773_p6 = pneg %p772_p5 }
  0x44   : > { %452 = vperm.xlu0 %766, %v345_v12   ;;  %448 = vperm.xlu1 %767, %v344_v9  }
  0x48   : > { %768 = vset.pattern.permute.xlu1 %v884_v14  ;;  %769 = vset.pattern.permute.xlu0 %v884_v14 }
  0x49   : > { %352 = vperm.xlu1 %768, %v342_v8   ;;  %357 = vperm.xlu0 %769, %v343_v11  }
  0x4d   : > { %362 = vperm.xlu1 %768, %v344_v9   ;;  %502 = vperm.xlu0 %769, %v346_v15  }
  0x51   : > { %367 = vperm.xlu1 %768, %v345_v12   ;;  %512 = vperm.xlu0 %769, %v348_v16  }
  0x55   : > { %507 = vperm.xlu1 %768, %v347_v17  }
  0x59   : > { %517 = vperm.xlu1 %768, %v349_v18  }
  0xb6   : > { %v380_v21 = vpop.permute.xlu0 %379  ;;  %v388_v26 = vpop.permute.xlu1 %387 }
  0xb7   : > { %v394_v22 = vmul.f32 %v380_v21, %v1071_v19  ;;  %v395_v23 = vmul.f32 %v380_v21, %v338_v20  ;;  %v398_v32 = vmul.f32 %v388_v26, %v1076_v27  ;;  %v399_v33 = vmul.f32 %v388_v26, %v340_v28 }
  0xb9   : > { %412 = vrot.lane.b32.xlu1 %v395_v23, %s885_s13  ;;  %410 = vrot.lane.b32.xlu0 %v394_v22, %s885_s13 }
  0xba   : > { %v384_v29 = vpop.permute.xlu0 %383  ;;  %v392_v34 = vpop.permute.xlu1 %391 }
  0xbb   : > { %v396_v30 = vmul.f32 %v384_v29, %v1074_v24  ;;  %v397_v31 = vmul.f32 %v384_v29, %v339_v25  ;;  %v400_v37 = vmul.f32 %v392_v34, %v1080_v35  ;;  %v401_v38 = vmul.f32 %v392_v34, %v341_v36 }
  0xbd   : > { %416 = vrot.lane.b32.xlu1 %v397_v31, %s885_s13  ;;  %414 = vrot.lane.b32.xlu0 %v396_v30, %s885_s13 }
  0xbf   : > { %v441_v39 = vpop.permute.xlu0 %440  ;;  %v445_v42 = vpop.permute.xlu1 %444 }
  0xc0   : > { %v455_v40 = vmul.f32 %v441_v39, %v1071_v19  ;;  %v456_v41 = vmul.f32 %v441_v39, %v338_v20  ;;  %v457_v43 = vmul.f32 %v445_v42, %v1074_v24  ;;  %v458_v44 = vmul.f32 %v445_v42, %v339_v25 }
  0xc1   : > { %420 = vrot.lane.b32.xlu1 %v399_v33, %s885_s13  ;;  %418 = vrot.lane.b32.xlu0 %v398_v32, %s885_s13 }
  0xc3   : > { %v449_v45 = vpop.permute.xlu1 %448  ;;  %v453_v48 = vpop.permute.xlu0 %452 }
  0xc4   : > { %v459_v46 = vmul.f32 %v449_v45, %v1076_v27  ;;  %v460_v47 = vmul.f32 %v449_v45, %v340_v28  ;;  %v461_v49 = vmul.f32 %v453_v48, %v1080_v35  ;;  %v462_v50 = vmul.f32 %v453_v48, %v341_v36 }
  0xc5   : > { %424 = vrot.lane.b32.xlu1 %v401_v38, %s885_s13  ;;  %422 = vrot.lane.b32.xlu0 %v400_v37, %s885_s13  ;;  %s774_s13 = sshll.u32 %s887_s28, 4  ;;  %s775_s13 = int_to_ptr.vmem [resolvable:$false] %s774_s13 }
  0xc6   : > { %p777_p7 = scmp.lt.s32.totalorder %s1102_s8, %s775_s13 }
  0xc8   : > { %v353_v51 = vpop.permute.xlu1 %352  ;;  %v358_v54 = vpop.permute.xlu0 %357 }
  0xc9   : > { %473 = vrot.lane.b32.xlu1 %v456_v41, %s886_s16  ;;  %471 = vrot.lane.b32.xlu0 %v455_v40, %s886_s16  ;;  %v370_v4 = vmul.f32 %v353_v51, %v1071_v19  ;;  %v371_v10 = vmul.f32 %v358_v54, %v1074_v24 }
  0xcc   : > { %v363_v52 = vpop.permute.xlu1 %362  ;;  %v503_v56 = vpop.permute.xlu0 %502 }
  0xcd   : > { %477 = vrot.lane.b32.xlu1 %v458_v44, %s886_s16  ;;  %475 = vrot.lane.b32.xlu0 %v457_v43, %s886_s16  ;;  %v372_v18 = vmul.f32 %v363_v52, %v1076_v27 }
  0xd0   : > { %v368_v53 = vpop.permute.xlu1 %367  ;;  %v513_v58 = vpop.permute.xlu0 %512 }
  0xd1   : > { %481 = vrot.lane.b32.xlu1 %v460_v47, %s886_s16  ;;  %479 = vrot.lane.b32.xlu0 %v459_v46, %s886_s16  ;;  %v373_v26 = vmul.f32 %v368_v53, %v1080_v35 }
  0xd4   : > { %v508_v55 = vpop.permute.xlu1 %507 }
  0xd5   : > { %485 = vrot.lane.b32.xlu1 %v462_v50, %s886_s16  ;;  %483 = vrot.lane.b32.xlu0 %v461_v49, %s886_s16  ;;  %s776_s16 = scalar_lea.vmem %s775_s13, 1024 }
  0xd6   : > { %p778_p8 = scmp.lt.s32.totalorder %s776_s16, %s770_s29 }
  0xd8   : > { %v518_v57 = vpop.permute.xlu1 %517  ;;  %p779_p9 = por %p778_p8, %p777_p7 }
  0xda   : > { %p780_p10 = pnand %p779_p9, %p773_p6 }
 0x12b   : > { %v413_v59 = vpop.permute.xlu1 %412  ;;  %v411_v60 = vpop.permute.xlu0 %410 }
 0x12c   : > { %v427_v3 = vsel %vm426_vm0, %v411_v60, %v413_v59 }
 0x12d   : > { %v435_v5 = vadd.f32 %v427_v3, %v370_v4 }
 0x12f   : > { %v417_v61 = vpop.permute.xlu1 %416  ;;  %v415_v62 = vpop.permute.xlu0 %414 }
 0x130   : > { %v428_v8 = vsel %vm426_vm0, %v415_v62, %v417_v61 }
 0x131   : > { %v436_v12 = vadd.f32 %v428_v8, %v371_v10 }
 0x133   : > { %v421_v63 = vpop.permute.xlu1 %420  ;;  %v419_v0 = vpop.permute.xlu0 %418 }
 0x134   : > { %v429_v16 = vsel %vm426_vm0, %v419_v0, %v421_v63 }
 0x135   : > { %v437_v20 = vadd.f32 %v429_v16, %v372_v18 }
 0x137   : > { %v425_v1 = vpop.permute.xlu1 %424  ;;  %v423_v2 = vpop.permute.xlu0 %422 }
 0x138   : > { %v430_v24 = vsel %vm426_vm0, %v423_v2, %v425_v1 }
 0x139   : > { %v438_v27 = vadd.f32 %v430_v24, %v373_v26 }
 0x13b   : > { %v474_v6 = vpop.permute.xlu1 %473  ;;  %v472_v7 = vpop.permute.xlu0 %471 }
 0x13c   : > { %v488_v9 = vsel %vm487_vm1, %v472_v7, %v474_v6 }
 0x13d   : > { %v496_v11 = vadd.f32 %v488_v9, %v435_v5 }
 0x13f   : > { %v520_v13 = vadd.f32 %v503_v56, %v496_v11  ;;  %v478_v14 = vpop.permute.xlu1 %477  ;;  %v476_v15 = vpop.permute.xlu0 %475 }
 0x140   : > { %v489_v17 = vsel %vm487_vm1, %v476_v15, %v478_v14 }
 0x141   : > { %524 = vst [vmem:[%s332_s12] sm:$0xff] %v520_v13  ;;  %v497_v19 = vadd.f32 %v489_v17, %v436_v12 }
 0x143   : > { %v521_v21 = vadd.f32 %v508_v55, %v497_v19  ;;  %v482_v22 = vpop.permute.xlu1 %481  ;;  %v480_v23 = vpop.permute.xlu0 %479 }
 0x144   : > { %v490_v25 = vsel %vm487_vm1, %v480_v23, %v482_v22 }
 0x145   : > { %525 = vst [vmem:[%s332_s12 + $0x8] sm:$0xff] %v521_v21  ;;  %v498_v28 = vadd.f32 %v490_v25, %v437_v20 }
 0x147   : > { %v522_v29 = vadd.f32 %v513_v58, %v498_v28  ;;  %v486_v30 = vpop.permute.xlu1 %485  ;;  %v484_v31 = vpop.permute.xlu0 %483 }
 0x148   : > { %v491_v32 = vsel %vm487_vm1, %v484_v31, %v486_v30 }
 0x149   : > { %526 = vst [vmem:[%s332_s12 + $0x10] sm:$0xff] %v522_v29  ;;  %v499_v33 = vadd.f32 %v491_v32, %v438_v27 }
 0x14b   : > { %v523_v34 = vadd.f32 %v518_v57, %v499_v33 }
 0x14d   : > { %527 = vst [vmem:[%s332_s12 + $0x18] sm:$0xff] %v523_v34 }
 0x14e   : > { %783 = shalt.err (!%p780_p10)
}
 0x14f   : > { %s784_s10 = scalar_lea.hbm %s1107_s11, 512  ;;  %s788_s5 = scalar_lea.hbm %s1173_s4, 2048 }
 0x150   : > { %p785_p12 = scmp.ne.s32.totalorder %s1107_s11, %s784_s10  ;;  %p789_p2 = scmp.lt.u32.totalorder %s1107_s11, %s1173_s4 }
 0x151   : > { %p790_p3 = scmp.lt.u32.totalorder %s788_s5, %s784_s10  ;;  %p792_p5 = scmp.lt.u32.totalorder %s784_s10, %s1107_s11 }
 0x152   : > { %p786_p0 = pnand %p785_p12, %p1007_p11 }
 0x153   : > { %p791_p4 = por %p790_p3, %p789_p2 }
 0x154   : > { %p787_p1 = pneg %p786_p0 }
 0x155   : > { %p793_p6 = por %p792_p5, %p791_p4 }
 0x157   : > { %p794_p7 = pnand %p793_p6, %p787_p1 }
 0x159   : > { %797 = shalt.err (!%p794_p7)
}
 0x15a   : > { %s888_s9 = smov 128   ;;  %s889_s29 = smov 256  }
 0x15b   : > { %s890_s28 = smov 8  }
 0x15c   : > { %669 = dma.vmem_to_hbm [thread:$0]  (%p1007_p11), %s1102_s8, 512, %s1107_s11, %s1111_s26, %s888_s9, %s889_s29, %s890_s28  }
 0x15d PF: > { %p675_p8 = scmp.ge.s32.totalorder %s880_s24, 2  ;;  %s558_s13 = sand.u32 1, %s844_s15  }
 0x15e   : > { %s559_s16 = scalar_lea.sflag [#allocation5], %s558_s13 }
 0x15f   : > { %p672_p9 = pnand %p675_p8, %p1017_p13 }
 0x161   : > { %839 = dma.done.wait (!%p672_p9), %s559_s16, 512  }
 0x162   : > { %841 = vsyncadd (!%p672_p9), %s559_s16, 4294966784  ;;  %s17_s24 = sadd.s32 1, %s880_s24   ;;  %s1180_s14 = sld [smem:[#allocation7_spill]] }
 0x163   : > { %p14_p10 = scmp.ge.s32.totalorder %s17_s24, 6   ;;  %s1181_s15 = smov %s856_s18 }
 0x164   : > { %s1182_s16 = smov %s852_s17  ;;  %s1183_s17 = smov %s1015_s7 }
 0x165   : > { %s1184_s18 = smov %s860_s19  ;;  %s1185_s19 = smov %s1012_s27 }
 0x166   : > { %s1186_s20 = smov %s872_s22  ;;  %s1187_s21 = smov %s876_s23 }
 0x167   : > { %s1188_s22 = smov %s974_s30  ;;  %16 = sbr.rel (!%p14_p10) target bundleno = 6 (0x6), region = 160 }
 0x168   : > { %s1189_s23 = smov %s1180_s14 }
 0x16e   :  { %564 = vsyncpa [#allocation5], 1 }
 0x16f   :  { %566 = vsyncpa [#allocation5 + $0x1], 1 }

</bundles_post_ra>
